<compile_context>
chip_gen: v6e
topology: v6e:2x2x1
jax: 0.10.0
libtpu: 0.0.40
codegen_flags: <defaults>
</compile_context>

<pallas_src>
import math

import jax
import jax.numpy as jnp
from jax import lax
from jax.experimental import pallas as pl
from jax.experimental.pallas import tpu as pltpu

NUM_CLASS = 10
SEQ_LEN = 300                      # L
W1_OUT = (SEQ_LEN - 4) // 3 + 1    # 99
W2_OUT = W1_OUT - 4                # 95
POOL_K = 95
NCH = 200                          # channel count of both convs
CONV_K = 16                        # taps of the fused conv1∘conv2 (3*4 + 3 + 1)
GROUP_W = 8                        # width positions packed per 128-lane patch row
N_WGROUP = 12                      # 96 / 8 width groups (95 real + 1 duplicate)
WPAD = GROUP_W * N_WGROUP          # 96
NCH_PAD = 256                      # conv channels padded 200 -> 256 (lane-dense)
NOUT_PAD = 128                     # classes padded 10 -> 128 (lane-dense stores)
TB_MAX = 64                        # samples per grid step

assert W2_OUT == POOL_K, "architecture requires exactly one pooling window"


def _round_up(n, m):
    return (n + m - 1) // m * m


def dpcnn_kernel(p_ref, wbd_ref, wf_ref, b_ref, out_ref):
    """One batch block of TB samples.

    p_ref   (N_WGROUP, TB, 128) bf16  : patch row g packs taps of widths 8g..8g+7
    wbd_ref (GROUP_W, 128, 256) bf16  : block-diagonal fused conv weight bank
    wf_ref  (256, 128)          bf16  : folded fc1∘fc2∘fc3 weight (zero padded)
    b_ref   (1, 128)            f32   : folded bias (conv bias + all FC biases)
    out_ref (TB, 128)           f32   : logits (cols 10..127 are zero)
    """
    tb = out_ref.shape[0]

    def outer(dw, acc):
        # Weight for width offset dw is held across all 12 inner matmuls, so the
        # MXU weight is reloaded only 8 times per block.
        w_dw = wbd_ref[dw]                                   # (128, 256) bf16
        for g in range(N_WGROUP):                            # static unroll (12)
            cw = jnp.dot(p_ref[g], w_dw,
                         preferred_element_type=jnp.float32)  # (tb, 256) f32
            acc = jnp.maximum(acc, cw)                        # streaming max-pool
        return acc

    # MaxPool2d((1,95)) streamed as a running maximum over all width positions.
    # (Dropout after conv2 is identity in eval mode.)
    pooled = lax.fori_loop(
        0, GROUP_W, outer,
        jnp.full((tb, NCH_PAD), -jnp.inf, jnp.float32))       # (tb, 256) f32

    # Folded FC tail (Linear(200,100)->Linear(100,50)->Dropout->Linear(50,10)
    # collapsed into one matmul; conv bias folded into the bias as well).
    logits = jnp.dot(pooled.astype(jnp.bfloat16), wf_ref[...],
                     preferred_element_type=jnp.float32) + b_ref[...]
    out_ref[...] = logits                                     # lane-dense (tb, 128)


def dpcnn_forward(x, w1, b1, w2, b2, wf1, bf1, wf2, bf2, wf3, bf3):
    """x: (B, SEQ_LEN). Parameters in their PyTorch layouts."""
    B = x.shape[0]
    f32 = jnp.float32
    x = x.astype(f32)
    w1, b1, w2, b2 = (a.astype(f32) for a in (w1, b1, w2, b2))
    wf1, bf1, wf2, bf2, wf3, bf3 = (a.astype(f32) for a in (wf1, bf1, wf2, bf2, wf3, bf3))

    # ---- conv1∘conv2 -> single exact 16-tap stride-3 convolution -------------
    # out2[c,w] = b_eff[c] + sum_t W_eff[c,t] * x[3w + t],  t = 3k + j in [0,16)
    w2r = w2.reshape(NCH, NCH, 5)                            # (c, i, k)
    w1r = w1.reshape(NCH, 4)                                 # (i, j)
    m = jnp.einsum('cik,ij->ckj', w2r, w1r)                  # (200, 5, 4)
    t_idx = (3 * jnp.arange(5)[:, None] + jnp.arange(4)[None, :]).reshape(-1)
    w_eff = jnp.zeros((NCH, CONV_K), f32).at[:, t_idx].add(m.reshape(NCH, 20))
    b_eff = b2 + w2r.sum(axis=2) @ b1                        # (200,)

    # ---- fold the fully linear FC tail + conv bias (exact at eval time) ------
    W_fc = wf1.T @ wf2.T @ wf3.T                             # (200, 10)
    b_fc = bf1 @ wf2.T @ wf3.T + bf2 @ wf3.T + bf3           # (10,)
    b_tot = b_eff @ W_fc + b_fc                              # max(x)+b == max(x+b)

    # Block-diagonal fused-conv weight bank: wbd[dw, dw*16+t, c] = W_eff[c, t].
    w_eff_t = jnp.zeros((CONV_K, NCH_PAD), f32).at[:, :NCH].set(w_eff.T)
    wbd = jnp.stack(
        [jnp.pad(w_eff_t,
                 ((CONV_K * dw, GROUP_W * CONV_K - CONV_K * (dw + 1)), (0, 0)))
         for dw in range(GROUP_W)], axis=0).astype(jnp.bfloat16)      # (8,128,256)

    wf_pad = (jnp.zeros((NCH_PAD, NOUT_PAD), f32)
              .at[:NCH, :NUM_CLASS].set(W_fc).astype(jnp.bfloat16))   # (256,128)
    b_pad = jnp.zeros((1, NOUT_PAD), f32).at[0, :NUM_CLASS].set(b_tot)

    # ---- batch tiling (even block count -> both v7x TensorCores are used) ----
    nb = max(1, math.ceil(B / TB_MAX))
    if nb > 1 and nb % 2 == 1:
        nb += 1
    TB = min(TB_MAX, _round_up(math.ceil(B / nb), 8))
    B_pad = nb * TB

    xb = jnp.pad(x, ((0, B_pad - B), (0, 0))).astype(jnp.bfloat16)    # (B_pad, 300)

    # ---- patch build: 16 static strided slices (no gather), lane-dense -------
    # pat[b, w, t] = x[b, 3w + t]; width padded 95 -> 96 by duplicating the last
    # valid window so the in-kernel max stays exact; then 8 widths x 16 taps are
    # packed per 128-lane row.
    last = 3 * (W2_OUT - 1)
    cols = [lax.slice(xb, (0, t), (B_pad, last + t + 1), (1, 3))
            for t in range(CONV_K)]                          # each (B_pad, 95)
    pat = jnp.stack(cols, axis=-1)                           # (B_pad, 95, 16)
    pat = jnp.concatenate([pat, pat[:, -1:, :]], axis=1)     # (B_pad, 96, 16)
    pat = pat.reshape(B_pad, N_WGROUP, GROUP_W * CONV_K)     # (B_pad, 12, 128)
    patches = jnp.transpose(pat, (1, 0, 2))                  # (12, B_pad, 128)

    out = pl.pallas_call(
        dpcnn_kernel,
        out_shape=jax.ShapeDtypeStruct((B_pad, NOUT_PAD), jnp.float32),
        grid=(nb,),
        in_specs=[
            pl.BlockSpec((N_WGROUP, TB, GROUP_W * CONV_K), lambda b: (0, b, 0)),
            # Constant index_maps -> weights DMA'd once and stay resident.
            pl.BlockSpec((GROUP_W, GROUP_W * CONV_K, NCH_PAD), lambda b: (0, 0, 0)),
            pl.BlockSpec((NCH_PAD, NOUT_PAD), lambda b: (0, 0)),
            pl.BlockSpec((1, NOUT_PAD), lambda b: (0, 0)),
        ],
        out_specs=pl.BlockSpec((TB, NOUT_PAD), lambda b: (b, 0)),
        compiler_params=pltpu.CompilerParams(
            dimension_semantics=("parallel",)),      # shard blocks across v7x TCs
    )(patches, wbd, wf_pad, b_pad)
    return out[:B, :NUM_CLASS]


def dpcnn_reference(x, w1, b1, w2, b2, wf1, bf1, wf2, bf2, wf3, bf3):
    """Pure-JAX mirror of the literal PyTorch forward (two NCHW convs)."""
    B = x.shape[0]
    xi = x.reshape(B, 1, 1, -1)
    dn = ("NCHW", "OIHW", "NCHW")
    y = jax.lax.conv_general_dilated(xi, w1, window_strides=(1, 3),
                                     padding="VALID", dimension_numbers=dn)
    y = y + b1.reshape(1, -1, 1, 1)                   # (B,200,1,W1)
    y = y.reshape(B, 1, 200, -1)
    y = jax.lax.conv_general_dilated(y, w2, window_strides=(200, 1),
                                     padding="VALID", dimension_numbers=dn)
    y = y + b2.reshape(1, -1, 1, 1)                   # (B,200,1,W2)
    y = y.reshape(B, 1, 200, -1)
    y = jax.lax.reduce_window(y, -jnp.inf, jax.lax.max,
                              window_dimensions=(1, 1, 1, POOL_K),
                              window_strides=(1, 1, 1, POOL_K),
                              padding="VALID")
    y = y.reshape(B, 200)
    y = y @ wf1.T + bf1
    y = y @ wf2.T + bf2
    y = y @ wf3.T + bf3
    return y


if __name__ == "__main__":
    key = jax.random.PRNGKey(0)
    keys = jax.random.split(key, 12)

    # Deterministic synthetic parameters (PyTorch-layout shapes).
    w1 = 0.05 * jax.random.normal(keys[1], (200, 1, 1, 4), dtype=jnp.float32)
    b1 = 0.05 * jax.random.normal(keys[2], (200,), dtype=jnp.float32)
    w2 = 0.05 * jax.random.normal(keys[3], (200, 1, 200, 5), dtype=jnp.float32)
    b2 = 0.05 * jax.random.normal(keys[4], (200,), dtype=jnp.float32)
    wf1 = 0.05 * jax.random.normal(keys[5], (100, 200), dtype=jnp.float32)
    bf1 = 0.05 * jax.random.normal(keys[6], (100,), dtype=jnp.float32)
    wf2 = 0.05 * jax.random.normal(keys[7], (50, 100), dtype=jnp.float32)
    bf2 = 0.05 * jax.random.normal(keys[8], (50,), dtype=jnp.float32)
    wf3 = 0.05 * jax.random.normal(keys[9], (NUM_CLASS, 50), dtype=jnp.float32)
    bf3 = 0.05 * jax.random.normal(keys[10], (NUM_CLASS,), dtype=jnp.float32)
    params = (w1, b1, w2, b2, wf1, bf1, wf2, bf2, wf3, bf3)

    fwd = jax.jit(dpcnn_forward)
    ref_fn = jax.jit(dpcnn_reference)

    # Small batch (single grid step) and a larger batch exercising the
    # multi-block grid (even block count) + batch-padding path.
    for B in (2, 130):
        x = jax.random.normal(keys[0], (B, SEQ_LEN), dtype=jnp.float32)
        out = jax.block_until_ready(fwd(x, *params))
        ref = jax.block_until_ready(ref_fn(x, *params))
        assert out.shape == (B, NUM_CLASS)
        max_err = float(jnp.max(jnp.abs(out - ref)))
        assert jnp.allclose(out, ref, atol=2e-2, rtol=2e-2), \
            f"B={B}: max_err={max_err}"

    print("KERNEL_OK")
</pallas_src>

<mosaic_0001>
module attributes {stable_mosaic.version = 11 : i64} {
  func.func @dpcnn_kernel(%arg0: i32, %arg1: memref<12x8x128xbf16, #tpu.memory_space<vmem>>, %arg2: memref<8x128x256xbf16, #tpu.memory_space<vmem>>, %arg3: memref<256x128xbf16, #tpu.memory_space<vmem>>, %arg4: memref<1x128xf32, #tpu.memory_space<vmem>>, %arg5: memref<8x128xf32, #tpu.memory_space<vmem>>) attributes {dimension_semantics = [#tpu.dimension_semantics<parallel>], iteration_bounds = array<i64: 1>, scalar_prefetch = 0 : i64, scratch_operands = 0 : i64, tpu.core_type = #tpu.core_type<tc>, window_params = [{transform_indices = @transform_0, window_bounds = array<i64: 12, 8, 128>}, {pipeline_mode = #tpu.pipeline_mode<synchronous>, transform_indices = @transform_1, window_bounds = array<i64: 8, 128, 256>}, {pipeline_mode = #tpu.pipeline_mode<synchronous>, transform_indices = @transform_2, window_bounds = array<i64: 256, 128>}, {pipeline_mode = #tpu.pipeline_mode<synchronous>, transform_indices = @transform_3, window_bounds = array<i64: 1, 128>}, {transform_indices = @transform_4, window_bounds = array<i64: 8, 128>}]} {
    %cst = arith.constant 0xFF800000 : f32
    %0 = vector.broadcast %cst : f32 to vector<8x256xf32>
    %c0_i32 = arith.constant 0 : i32
    %c8_i32 = arith.constant 8 : i32
    %1 = arith.addi %c0_i32, %c8_i32 : i32
    %c1_i32 = arith.constant 1 : i32
    %2 = scf.for %arg6 = %c0_i32 to %1 step %c1_i32 iter_args(%arg7 = %0) -> (vector<8x256xf32>)  : i32 {
      %10 = arith.index_cast %arg6 : i32 to index
      %c0_7 = arith.constant 0 : index
      %c0_8 = arith.constant 0 : index
      %11 = vector.load %arg2[%10, %c0_7, %c0_8] : memref<8x128x256xbf16, #tpu.memory_space<vmem>>, vector<1x128x256xbf16>
      %12 = vector.shape_cast %11 : vector<1x128x256xbf16> to vector<128x256xbf16>
      %c0_9 = arith.constant 0 : index
      %c0_10 = arith.constant 0 : index
      %c0_11 = arith.constant 0 : index
      %13 = vector.load %arg1[%c0_9, %c0_10, %c0_11] : memref<12x8x128xbf16, #tpu.memory_space<vmem>>, vector<1x8x128xbf16>
      %14 = vector.shape_cast %13 : vector<1x8x128xbf16> to vector<8x128xbf16>
      %cst_12 = arith.constant dense<0.000000e+00> : vector<8x256xf32>
      %15 = tpu.matmul %14, %12, %cst_12 {dimension_numbers = #tpu.dot_dimension_numbers<[1], [0], [0], [1], [0, 0, 1, 1], [], []>} : vector<8x128xbf16>, vector<128x256xbf16>, vector<8x256xf32> -> vector<8x256xf32>
      %16 = arith.maximumf %arg7, %15 : vector<8x256xf32>
      %c1 = arith.constant 1 : index
      %c0_13 = arith.constant 0 : index
      %c0_14 = arith.constant 0 : index
      %17 = vector.load %arg1[%c1, %c0_13, %c0_14] : memref<12x8x128xbf16, #tpu.memory_space<vmem>>, vector<1x8x128xbf16>
      %18 = vector.shape_cast %17 : vector<1x8x128xbf16> to vector<8x128xbf16>
      %cst_15 = arith.constant dense<0.000000e+00> : vector<8x256xf32>
      %19 = tpu.matmul %18, %12, %cst_15 {dimension_numbers = #tpu.dot_dimension_numbers<[1], [0], [0], [1], [0, 0, 1, 1], [], []>} : vector<8x128xbf16>, vector<128x256xbf16>, vector<8x256xf32> -> vector<8x256xf32>
      %20 = arith.maximumf %16, %19 : vector<8x256xf32>
      %c2 = arith.constant 2 : index
      %c0_16 = arith.constant 0 : index
      %c0_17 = arith.constant 0 : index
      %21 = vector.load %arg1[%c2, %c0_16, %c0_17] : memref<12x8x128xbf16, #tpu.memory_space<vmem>>, vector<1x8x128xbf16>
      %22 = vector.shape_cast %21 : vector<1x8x128xbf16> to vector<8x128xbf16>
      %cst_18 = arith.constant dense<0.000000e+00> : vector<8x256xf32>
      %23 = tpu.matmul %22, %12, %cst_18 {dimension_numbers = #tpu.dot_dimension_numbers<[1], [0], [0], [1], [0, 0, 1, 1], [], []>} : vector<8x128xbf16>, vector<128x256xbf16>, vector<8x256xf32> -> vector<8x256xf32>
      %24 = arith.maximumf %20, %23 : vector<8x256xf32>
      %c3 = arith.constant 3 : index
      %c0_19 = arith.constant 0 : index
      %c0_20 = arith.constant 0 : index
      %25 = vector.load %arg1[%c3, %c0_19, %c0_20] : memref<12x8x128xbf16, #tpu.memory_space<vmem>>, vector<1x8x128xbf16>
      %26 = vector.shape_cast %25 : vector<1x8x128xbf16> to vector<8x128xbf16>
      %cst_21 = arith.constant dense<0.000000e+00> : vector<8x256xf32>
      %27 = tpu.matmul %26, %12, %cst_21 {dimension_numbers = #tpu.dot_dimension_numbers<[1], [0], [0], [1], [0, 0, 1, 1], [], []>} : vector<8x128xbf16>, vector<128x256xbf16>, vector<8x256xf32> -> vector<8x256xf32>
      %28 = arith.maximumf %24, %27 : vector<8x256xf32>
      %c4 = arith.constant 4 : index
      %c0_22 = arith.constant 0 : index
      %c0_23 = arith.constant 0 : index
      %29 = vector.load %arg1[%c4, %c0_22, %c0_23] : memref<12x8x128xbf16, #tpu.memory_space<vmem>>, vector<1x8x128xbf16>
      %30 = vector.shape_cast %29 : vector<1x8x128xbf16> to vector<8x128xbf16>
      %cst_24 = arith.constant dense<0.000000e+00> : vector<8x256xf32>
      %31 = tpu.matmul %30, %12, %cst_24 {dimension_numbers = #tpu.dot_dimension_numbers<[1], [0], [0], [1], [0, 0, 1, 1], [], []>} : vector<8x128xbf16>, vector<128x256xbf16>, vector<8x256xf32> -> vector<8x256xf32>
      %32 = arith.maximumf %28, %31 : vector<8x256xf32>
      %c5 = arith.constant 5 : index
      %c0_25 = arith.constant 0 : index
      %c0_26 = arith.constant 0 : index
      %33 = vector.load %arg1[%c5, %c0_25, %c0_26] : memref<12x8x128xbf16, #tpu.memory_space<vmem>>, vector<1x8x128xbf16>
      %34 = vector.shape_cast %33 : vector<1x8x128xbf16> to vector<8x128xbf16>
      %cst_27 = arith.constant dense<0.000000e+00> : vector<8x256xf32>
      %35 = tpu.matmul %34, %12, %cst_27 {dimension_numbers = #tpu.dot_dimension_numbers<[1], [0], [0], [1], [0, 0, 1, 1], [], []>} : vector<8x128xbf16>, vector<128x256xbf16>, vector<8x256xf32> -> vector<8x256xf32>
      %36 = arith.maximumf %32, %35 : vector<8x256xf32>
      %c6 = arith.constant 6 : index
      %c0_28 = arith.constant 0 : index
      %c0_29 = arith.constant 0 : index
      %37 = vector.load %arg1[%c6, %c0_28, %c0_29] : memref<12x8x128xbf16, #tpu.memory_space<vmem>>, vector<1x8x128xbf16>
      %38 = vector.shape_cast %37 : vector<1x8x128xbf16> to vector<8x128xbf16>
      %cst_30 = arith.constant dense<0.000000e+00> : vector<8x256xf32>
      %39 = tpu.matmul %38, %12, %cst_30 {dimension_numbers = #tpu.dot_dimension_numbers<[1], [0], [0], [1], [0, 0, 1, 1], [], []>} : vector<8x128xbf16>, vector<128x256xbf16>, vector<8x256xf32> -> vector<8x256xf32>
      %40 = arith.maximumf %36, %39 : vector<8x256xf32>
      %c7 = arith.constant 7 : index
      %c0_31 = arith.constant 0 : index
      %c0_32 = arith.constant 0 : index
      %41 = vector.load %arg1[%c7, %c0_31, %c0_32] : memref<12x8x128xbf16, #tpu.memory_space<vmem>>, vector<1x8x128xbf16>
      %42 = vector.shape_cast %41 : vector<1x8x128xbf16> to vector<8x128xbf16>
      %cst_33 = arith.constant dense<0.000000e+00> : vector<8x256xf32>
      %43 = tpu.matmul %42, %12, %cst_33 {dimension_numbers = #tpu.dot_dimension_numbers<[1], [0], [0], [1], [0, 0, 1, 1], [], []>} : vector<8x128xbf16>, vector<128x256xbf16>, vector<8x256xf32> -> vector<8x256xf32>
      %44 = arith.maximumf %40, %43 : vector<8x256xf32>
      %c8 = arith.constant 8 : index
      %c0_34 = arith.constant 0 : index
      %c0_35 = arith.constant 0 : index
      %45 = vector.load %arg1[%c8, %c0_34, %c0_35] : memref<12x8x128xbf16, #tpu.memory_space<vmem>>, vector<1x8x128xbf16>
      %46 = vector.shape_cast %45 : vector<1x8x128xbf16> to vector<8x128xbf16>
      %cst_36 = arith.constant dense<0.000000e+00> : vector<8x256xf32>
      %47 = tpu.matmul %46, %12, %cst_36 {dimension_numbers = #tpu.dot_dimension_numbers<[1], [0], [0], [1], [0, 0, 1, 1], [], []>} : vector<8x128xbf16>, vector<128x256xbf16>, vector<8x256xf32> -> vector<8x256xf32>
      %48 = arith.maximumf %44, %47 : vector<8x256xf32>
      %c9 = arith.constant 9 : index
      %c0_37 = arith.constant 0 : index
      %c0_38 = arith.constant 0 : index
      %49 = vector.load %arg1[%c9, %c0_37, %c0_38] : memref<12x8x128xbf16, #tpu.memory_space<vmem>>, vector<1x8x128xbf16>
      %50 = vector.shape_cast %49 : vector<1x8x128xbf16> to vector<8x128xbf16>
      %cst_39 = arith.constant dense<0.000000e+00> : vector<8x256xf32>
      %51 = tpu.matmul %50, %12, %cst_39 {dimension_numbers = #tpu.dot_dimension_numbers<[1], [0], [0], [1], [0, 0, 1, 1], [], []>} : vector<8x128xbf16>, vector<128x256xbf16>, vector<8x256xf32> -> vector<8x256xf32>
      %52 = arith.maximumf %48, %51 : vector<8x256xf32>
      %c10 = arith.constant 10 : index
      %c0_40 = arith.constant 0 : index
      %c0_41 = arith.constant 0 : index
      %53 = vector.load %arg1[%c10, %c0_40, %c0_41] : memref<12x8x128xbf16, #tpu.memory_space<vmem>>, vector<1x8x128xbf16>
      %54 = vector.shape_cast %53 : vector<1x8x128xbf16> to vector<8x128xbf16>
      %cst_42 = arith.constant dense<0.000000e+00> : vector<8x256xf32>
      %55 = tpu.matmul %54, %12, %cst_42 {dimension_numbers = #tpu.dot_dimension_numbers<[1], [0], [0], [1], [0, 0, 1, 1], [], []>} : vector<8x128xbf16>, vector<128x256xbf16>, vector<8x256xf32> -> vector<8x256xf32>
      %56 = arith.maximumf %52, %55 : vector<8x256xf32>
      %c11 = arith.constant 11 : index
      %c0_43 = arith.constant 0 : index
      %c0_44 = arith.constant 0 : index
      %57 = vector.load %arg1[%c11, %c0_43, %c0_44] : memref<12x8x128xbf16, #tpu.memory_space<vmem>>, vector<1x8x128xbf16>
      %58 = vector.shape_cast %57 : vector<1x8x128xbf16> to vector<8x128xbf16>
      %cst_45 = arith.constant dense<0.000000e+00> : vector<8x256xf32>
      %59 = tpu.matmul %58, %12, %cst_45 {dimension_numbers = #tpu.dot_dimension_numbers<[1], [0], [0], [1], [0, 0, 1, 1], [], []>} : vector<8x128xbf16>, vector<128x256xbf16>, vector<8x256xf32> -> vector<8x256xf32>
      %60 = arith.maximumf %56, %59 : vector<8x256xf32>
      scf.yield %60 : vector<8x256xf32>
    }
    %c8_i32_0 = arith.constant 8 : i32
    %3 = arith.truncf %2 : vector<8x256xf32> to vector<8x256xbf16>
    %c0 = arith.constant 0 : index
    %c0_1 = arith.constant 0 : index
    %4 = vector.load %arg3[%c0, %c0_1] : memref<256x128xbf16, #tpu.memory_space<vmem>>, vector<256x128xbf16>
    %cst_2 = arith.constant dense<0.000000e+00> : vector<8x128xf32>
    %5 = tpu.matmul %3, %4, %cst_2 {dimension_numbers = #tpu.dot_dimension_numbers<[1], [0], [0], [1], [0, 0, 1, 1], [], []>} : vector<8x256xbf16>, vector<256x128xbf16>, vector<8x128xf32> -> vector<8x128xf32>
    %c0_3 = arith.constant 0 : index
    %c0_4 = arith.constant 0 : index
    %6 = vector.load %arg4[%c0_3, %c0_4] : memref<1x128xf32, #tpu.memory_space<vmem>>, vector<1x128xf32>
    %7 = vector.broadcast %6 : vector<1x128xf32> to vector<8x128xf32>
    %8 = arith.addf %5, %7 : vector<8x128xf32>
    %c0_5 = arith.constant 0 : index
    %c0_6 = arith.constant 0 : index
    %9 = vector.load %arg5[%c0_5, %c0_6] : memref<8x128xf32, #tpu.memory_space<vmem>>, vector<8x128xf32>
    tpu.vector_store %arg5[%c0_5, %c0_6], %8 {strides = array<i32>} : memref<8x128xf32, #tpu.memory_space<vmem>>, vector<8x128xf32>,
    return
  }
  func.func @transform_0(%arg0: i32) -> (i32, i32, i32) {
    %c0_i32 = arith.constant 0 : i32
    %c0_i32_0 = arith.constant 0 : i32
    %c0_i32_1 = arith.constant 0 : i32
    return %c0_i32, %arg0, %c0_i32_0 : i32, i32, i32
  }
  func.func @transform_1(%arg0: i32) -> (i32, i32, i32) {
    %c0_i32 = arith.constant 0 : i32
    %c0_i32_0 = arith.constant 0 : i32
    %c0_i32_1 = arith.constant 0 : i32
    %c0_i32_2 = arith.constant 0 : i32
    return %c0_i32, %c0_i32_0, %c0_i32_1 : i32, i32, i32
  }
  func.func @transform_2(%arg0: i32) -> (i32, i32) {
    %c0_i32 = arith.constant 0 : i32
    %c0_i32_0 = arith.constant 0 : i32
    %c0_i32_1 = arith.constant 0 : i32
    return %c0_i32, %c0_i32_0 : i32, i32
  }
  func.func @transform_3(%arg0: i32) -> (i32, i32) {
    %c0_i32 = arith.constant 0 : i32
    %c0_i32_0 = arith.constant 0 : i32
    %c0_i32_1 = arith.constant 0 : i32
    return %c0_i32, %c0_i32_0 : i32, i32
  }
  func.func @transform_4(%arg0: i32) -> (i32, i32) {
    %c0_i32 = arith.constant 0 : i32
    %c0_i32_0 = arith.constant 0 : i32
    return %arg0, %c0_i32 : i32, i32
  }
}

</mosaic_0001>

<bundles_post_ra>
// kernel: dpcnn_forward.1
= control target key start
LH: loop header
LB: loop body
LE: loop exit
PB: predicated region body
PF: predicated region fallthrough
CT: control target
= control target key end

     0   :  { %v1043_v0 = vmov -inf   ;;  %v1045_v1 = vmov -inf   ;;  %s1047_s15 = smov 0   ;;  %s1415_s0 = inlined_call_operand.vmem [shape: bf16[12,8,128], index: 0, kind: input, shape index: {}]   ;;  %s1416_s1 = inlined_call_operand.vmem [shape: bf16[8,128,256], index: 1, kind: input, shape index: {}]   ;;  %s1417_s2 = inlined_call_operand.vmem [shape: bf16[256,128], index: 2, kind: input, shape index: {}]   ;;  %s1418_s3 = inlined_call_operand.vmem [shape: f32[1,128], index: 3, kind: input, shape index: {}]   ;;  %s1419_s4 = inlined_call_operand.vmem [shape: f32[8,128], index: 4, kind: output, shape index: {}]  }
   0x1 LB: > { %v1017_v2 = vmov 0   ;;  %s905_s16 = sshll.u32 %s1015_s15, 7  ;;  %v45_v19 = vld [vmem:[%s1415_s0] sm:$0xf]  ;;  %v877_v20 = vld [vmem:[%s1415_s0 + $0x4] sm:$0xf]  ;;  %s1015_s15 = sphi %s1047_s15, %s23_s15   ;;  %v1011_v1 = vphi %v1045_v1, %v1421_v1   ;;  %v1007_v0 = vphi %v1043_v0, %v1420_v0  }
   0x2   : > { %158 = vmatprep.mubr.bf16.mxu0 %v1017_v2  ;;  %203 = vmatprep.mubr.bf16.mxu1 %v1017_v2  ;;  %s1064_s19 = scalar_lea.vmem %s1416_s1, %s905_s16  ;;  %v878_v21 = vld [vmem:[%s1415_s0 + $0x8] sm:$0xf]  ;;  %v879_v22 = vld [vmem:[%s1415_s0 + $0xc] sm:$0xf]  ;;  %v880_v23 = vld [vmem:[%s1415_s0 + $0x10] sm:$0xf] }
   0x3   : > { %v1067_v3 = vld [vmem:[%s1064_s19 + $0x74] ss:$8 sps:$4 sm:$0xff]   ;;  %v1070_v4 = vld [vmem:[%s1064_s19 + $0x70] ss:$8 sps:$4 sm:$0xff]   ;;  %v1075_v5 = vld [vmem:[%s1064_s19 + $0x64] ss:$8 sps:$4 sm:$0xff]  }
   0x4   : > { %126 = vmatprep.subr.bf16.mxu0 %v1067_v3  ;;  %171 = vmatprep.subr.bf16.mxu1 %v1067_v3  ;;  %v1080_v6 = vld [vmem:[%s1064_s19 + $0x60] ss:$8 sps:$4 sm:$0xff]   ;;  %v1085_v7 = vld [vmem:[%s1064_s19 + $0x54] ss:$8 sps:$4 sm:$0xff]   ;;  %v1090_v8 = vld [vmem:[%s1064_s19 + $0x50] ss:$8 sps:$4 sm:$0xff]  }
   0x5   : > { %127 = vmatpush1.bf16.msra.mxu0 %v1070_v4  ;;  %172 = vmatpush1.bf16.msra.mxu1 %v1070_v4  ;;  %v1095_v9 = vld [vmem:[%s1064_s19 + $0x44] ss:$8 sps:$4 sm:$0xff]   ;;  %v1100_v10 = vld [vmem:[%s1064_s19 + $0x40] ss:$8 sps:$4 sm:$0xff]   ;;  %v1105_v11 = vld [vmem:[%s1064_s19 + $0x34] ss:$8 sps:$4 sm:$0xff]  }
   0x6   : > { %128 = vmatprep.subr.bf16.mxu0 %v1075_v5  ;;  %173 = vmatprep.subr.bf16.mxu1 %v1075_v5  ;;  %v1110_v12 = vld [vmem:[%s1064_s19 + $0x30] ss:$8 sps:$4 sm:$0xff]   ;;  %v1115_v13 = vld [vmem:[%s1064_s19 + $0x24] ss:$8 sps:$4 sm:$0xff]   ;;  %v1120_v14 = vld [vmem:[%s1064_s19 + $0x20] ss:$8 sps:$4 sm:$0xff]  }
   0x7   : > { %v1125_v15 = vld [vmem:[%s1064_s19 + $0x14] ss:$8 sps:$4 sm:$0xff]   ;;  %v1130_v16 = vld [vmem:[%s1064_s19 + $0x10] ss:$8 sps:$4 sm:$0xff]   ;;  %v1135_v17 = vld [vmem:[%s1064_s19 + $0x4] ss:$8 sps:$4 sm:$0xff]  }
   0x8   : > { %v1140_v18 = vld [vmem:[%s1064_s19] ss:$8 sps:$4 sm:$0xff]   ;;  %v881_v24 = vld [vmem:[%s1415_s0 + $0x14] sm:$0xf]  ;;  %v882_v25 = vld [vmem:[%s1415_s0 + $0x18] sm:$0xf] }
   0x9   : > { %129 = vmatpush1.bf16.msra.mxu0 %v1080_v6  ;;  %174 = vmatpush1.bf16.msra.mxu1 %v1080_v6  ;;  %v883_v26 = vld [vmem:[%s1415_s0 + $0x1c] sm:$0xf]  ;;  %v884_v27 = vld [vmem:[%s1415_s0 + $0x20] sm:$0xf]  ;;  %v885_v28 = vld [vmem:[%s1415_s0 + $0x24] sm:$0xf] }
   0xa   : > { %130 = vmatprep.subr.bf16.mxu0 %v1085_v7  ;;  %175 = vmatprep.subr.bf16.mxu1 %v1085_v7  ;;  %v886_v29 = vld [vmem:[%s1415_s0 + $0x28] sm:$0xf]  ;;  %v887_v30 = vld [vmem:[%s1415_s0 + $0x2c] sm:$0xf]  ;;  %s23_s15 = sadd.s32 1, %s1015_s15  }
   0xb   : > { %p20_p0 = scmp.ge.s32.totalorder %s23_s15, 8  }
   0xd   : > { %131 = vmatpush1.bf16.msra.mxu0 %v1090_v8  ;;  %176 = vmatpush1.bf16.msra.mxu1 %v1090_v8 }
   0xe   : > { %132 = vmatprep.subr.bf16.mxu0 %v1095_v9  ;;  %177 = vmatprep.subr.bf16.mxu1 %v1095_v9 }
  0x11   : > { %133 = vmatpush1.bf16.msra.mxu0 %v1100_v10  ;;  %178 = vmatpush1.bf16.msra.mxu1 %v1100_v10 }
  0x12   : > { %134 = vmatprep.subr.bf16.mxu0 %v1105_v11  ;;  %179 = vmatprep.subr.bf16.mxu1 %v1105_v11 }
  0x15   : > { %135 = vmatpush1.bf16.msra.mxu0 %v1110_v12  ;;  %180 = vmatpush1.bf16.msra.mxu1 %v1110_v12 }
  0x16   : > { %136 = vmatprep.subr.bf16.mxu0 %v1115_v13  ;;  %181 = vmatprep.subr.bf16.mxu1 %v1115_v13 }
  0x19   : > { %137 = vmatpush1.bf16.msra.mxu0 %v1120_v14  ;;  %182 = vmatpush1.bf16.msra.mxu1 %v1120_v14 }
  0x1a   : > { %138 = vmatprep.subr.bf16.mxu0 %v1125_v15  ;;  %183 = vmatprep.subr.bf16.mxu1 %v1125_v15 }
  0x1d   : > { %139 = vmatpush1.bf16.msra.mxu0 %v1130_v16  ;;  %184 = vmatpush1.bf16.msra.mxu1 %v1130_v16 }
  0x1e   : > { %140 = vmatprep.subr.bf16.mxu0 %v1135_v17  ;;  %185 = vmatprep.subr.bf16.mxu1 %v1135_v17 }
  0x21   : > { %141 = vmatpush1.bf16.msra.mxu0 %v1140_v18  ;;  %186 = vmatpush1.bf16.msra.mxu1 %v1140_v18 }
  0x22   : > { %216 = vmatprep.subr.bf16.mxu0 %v1067_v3  ;;  %261 = vmatprep.subr.bf16.mxu1 %v1067_v3 }
  0x24   : > { %159 = vmatmul.mubr.bf16.vlgmr.msra.gmra.mxu0 %v45_v19  ;;  %204 = vmatmul.mubr.bf16.vlgmr.msra.gmra.mxu1 %v877_v20 }
  0x25   : > { %217 = vmatpush1.bf16.msra.mxu0 %v1070_v4  ;;  %262 = vmatpush1.bf16.msra.mxu1 %v1070_v4 }
  0x26   : > { %218 = vmatprep.subr.bf16.mxu0 %v1075_v5  ;;  %263 = vmatprep.subr.bf16.mxu1 %v1075_v5 }
  0x27   : > { %248 = vmatprep.mubr.bf16.mxu0 %v1017_v2  ;;  %293 = vmatprep.mubr.bf16.mxu1 %v1017_v2 }
  0x29   : > { %219 = vmatpush1.bf16.msra.mxu0 %v1080_v6  ;;  %264 = vmatpush1.bf16.msra.mxu1 %v1080_v6 }
  0x2a   : > { %220 = vmatprep.subr.bf16.mxu0 %v1085_v7  ;;  %265 = vmatprep.subr.bf16.mxu1 %v1085_v7 }
  0x2d   : > { %221 = vmatpush1.bf16.msra.mxu0 %v1090_v8  ;;  %266 = vmatpush1.bf16.msra.mxu1 %v1090_v8 }
  0x2e   : > { %222 = vmatprep.subr.bf16.mxu0 %v1095_v9  ;;  %267 = vmatprep.subr.bf16.mxu1 %v1095_v9 }
  0x31   : > { %223 = vmatpush1.bf16.msra.mxu0 %v1100_v10  ;;  %268 = vmatpush1.bf16.msra.mxu1 %v1100_v10 }
  0x32   : > { %224 = vmatprep.subr.bf16.mxu0 %v1105_v11  ;;  %269 = vmatprep.subr.bf16.mxu1 %v1105_v11 }
  0x35   : > { %225 = vmatpush1.bf16.msra.mxu0 %v1110_v12  ;;  %270 = vmatpush1.bf16.msra.mxu1 %v1110_v12 }
  0x36   : > { %226 = vmatprep.subr.bf16.mxu0 %v1115_v13  ;;  %271 = vmatprep.subr.bf16.mxu1 %v1115_v13 }
  0x39   : > { %227 = vmatpush1.bf16.msra.mxu0 %v1120_v14  ;;  %272 = vmatpush1.bf16.msra.mxu1 %v1120_v14 }
  0x3a   : > { %228 = vmatprep.subr.bf16.mxu0 %v1125_v15  ;;  %273 = vmatprep.subr.bf16.mxu1 %v1125_v15 }
  0x3d   : > { %229 = vmatpush1.bf16.msra.mxu0 %v1130_v16  ;;  %274 = vmatpush1.bf16.msra.mxu1 %v1130_v16 }
  0x3e   : > { %230 = vmatprep.subr.bf16.mxu0 %v1135_v17  ;;  %275 = vmatprep.subr.bf16.mxu1 %v1135_v17 }
  0x41   : > { %231 = vmatpush1.bf16.msra.mxu0 %v1140_v18  ;;  %276 = vmatpush1.bf16.msra.mxu1 %v1140_v18 }
  0x42   : > { %306 = vmatprep.subr.bf16.mxu0 %v1067_v3  ;;  %351 = vmatprep.subr.bf16.mxu1 %v1067_v3 }
  0x44   : > { %249 = vmatmul.mubr.bf16.vlgmr.msra.gmra.mxu0 %v878_v21  ;;  %294 = vmatmul.mubr.bf16.vlgmr.msra.gmra.mxu1 %v879_v22 }
  0x45   : > { %307 = vmatpush1.bf16.msra.mxu0 %v1070_v4  ;;  %352 = vmatpush1.bf16.msra.mxu1 %v1070_v4 }
  0x46   : > { %308 = vmatprep.subr.bf16.mxu0 %v1075_v5  ;;  %353 = vmatprep.subr.bf16.mxu1 %v1075_v5 }
  0x47   : > { %338 = vmatprep.mubr.bf16.mxu0 %v1017_v2  ;;  %383 = vmatprep.mubr.bf16.mxu1 %v1017_v2 }
  0x49   : > { %309 = vmatpush1.bf16.msra.mxu0 %v1080_v6  ;;  %354 = vmatpush1.bf16.msra.mxu1 %v1080_v6 }
  0x4a   : > { %310 = vmatprep.subr.bf16.mxu0 %v1085_v7  ;;  %355 = vmatprep.subr.bf16.mxu1 %v1085_v7 }
  0x4d   : > { %311 = vmatpush1.bf16.msra.mxu0 %v1090_v8  ;;  %356 = vmatpush1.bf16.msra.mxu1 %v1090_v8 }
  0x4e   : > { %312 = vmatprep.subr.bf16.mxu0 %v1095_v9  ;;  %357 = vmatprep.subr.bf16.mxu1 %v1095_v9 }
  0x51   : > { %313 = vmatpush1.bf16.msra.mxu0 %v1100_v10  ;;  %358 = vmatpush1.bf16.msra.mxu1 %v1100_v10 }
  0x52   : > { %314 = vmatprep.subr.bf16.mxu0 %v1105_v11  ;;  %359 = vmatprep.subr.bf16.mxu1 %v1105_v11 }
  0x55   : > { %315 = vmatpush1.bf16.msra.mxu0 %v1110_v12  ;;  %360 = vmatpush1.bf16.msra.mxu1 %v1110_v12 }
  0x56   : > { %316 = vmatprep.subr.bf16.mxu0 %v1115_v13  ;;  %361 = vmatprep.subr.bf16.mxu1 %v1115_v13 }
  0x59   : > { %317 = vmatpush1.bf16.msra.mxu0 %v1120_v14  ;;  %362 = vmatpush1.bf16.msra.mxu1 %v1120_v14 }
  0x5a   : > { %318 = vmatprep.subr.bf16.mxu0 %v1125_v15  ;;  %363 = vmatprep.subr.bf16.mxu1 %v1125_v15 }
  0x5d   : > { %319 = vmatpush1.bf16.msra.mxu0 %v1130_v16  ;;  %364 = vmatpush1.bf16.msra.mxu1 %v1130_v16 }
  0x5e   : > { %320 = vmatprep.subr.bf16.mxu0 %v1135_v17  ;;  %365 = vmatprep.subr.bf16.mxu1 %v1135_v17 }
  0x61   : > { %321 = vmatpush1.bf16.msra.mxu0 %v1140_v18  ;;  %366 = vmatpush1.bf16.msra.mxu1 %v1140_v18 }
  0x62   : > { %396 = vmatprep.subr.bf16.mxu0 %v1067_v3  ;;  %441 = vmatprep.subr.bf16.mxu1 %v1067_v3 }
  0x64   : > { %339 = vmatmul.mubr.bf16.vlgmr.msra.gmra.mxu0 %v880_v23  ;;  %384 = vmatmul.mubr.bf16.vlgmr.msra.gmra.mxu1 %v881_v24 }
  0x65   : > { %397 = vmatpush1.bf16.msra.mxu0 %v1070_v4  ;;  %442 = vmatpush1.bf16.msra.mxu1 %v1070_v4 }
  0x66   : > { %398 = vmatprep.subr.bf16.mxu0 %v1075_v5  ;;  %443 = vmatprep.subr.bf16.mxu1 %v1075_v5 }
  0x67   : > { %428 = vmatprep.mubr.bf16.mxu0 %v1017_v2  ;;  %473 = vmatprep.mubr.bf16.mxu1 %v1017_v2 }
  0x69   : > { %399 = vmatpush1.bf16.msra.mxu0 %v1080_v6  ;;  %444 = vmatpush1.bf16.msra.mxu1 %v1080_v6 }
  0x6a   : > { %400 = vmatprep.subr.bf16.mxu0 %v1085_v7  ;;  %445 = vmatprep.subr.bf16.mxu1 %v1085_v7 }
  0x6d   : > { %401 = vmatpush1.bf16.msra.mxu0 %v1090_v8  ;;  %446 = vmatpush1.bf16.msra.mxu1 %v1090_v8 }
  0x6e   : > { %402 = vmatprep.subr.bf16.mxu0 %v1095_v9  ;;  %447 = vmatprep.subr.bf16.mxu1 %v1095_v9 }
  0x71   : > { %403 = vmatpush1.bf16.msra.mxu0 %v1100_v10  ;;  %448 = vmatpush1.bf16.msra.mxu1 %v1100_v10 }
  0x72   : > { %404 = vmatprep.subr.bf16.mxu0 %v1105_v11  ;;  %449 = vmatprep.subr.bf16.mxu1 %v1105_v11 }
  0x75   : > { %405 = vmatpush1.bf16.msra.mxu0 %v1110_v12  ;;  %450 = vmatpush1.bf16.msra.mxu1 %v1110_v12 }
  0x76   : > { %406 = vmatprep.subr.bf16.mxu0 %v1115_v13  ;;  %451 = vmatprep.subr.bf16.mxu1 %v1115_v13 }
  0x79   : > { %407 = vmatpush1.bf16.msra.mxu0 %v1120_v14  ;;  %452 = vmatpush1.bf16.msra.mxu1 %v1120_v14 }
  0x7a   : > { %408 = vmatprep.subr.bf16.mxu0 %v1125_v15  ;;  %453 = vmatprep.subr.bf16.mxu1 %v1125_v15 }
  0x7d   : > { %409 = vmatpush1.bf16.msra.mxu0 %v1130_v16  ;;  %454 = vmatpush1.bf16.msra.mxu1 %v1130_v16 }
  0x7e   : > { %410 = vmatprep.subr.bf16.mxu0 %v1135_v17  ;;  %455 = vmatprep.subr.bf16.mxu1 %v1135_v17 }
  0x81   : > { %411 = vmatpush1.bf16.msra.mxu0 %v1140_v18  ;;  %456 = vmatpush1.bf16.msra.mxu1 %v1140_v18 }
  0x82   : > { %486 = vmatprep.subr.bf16.mxu0 %v1067_v3  ;;  %531 = vmatprep.subr.bf16.mxu1 %v1067_v3 }
  0x84   : > { %429 = vmatmul.mubr.bf16.vlgmr.msra.gmra.mxu0 %v882_v25  ;;  %474 = vmatmul.mubr.bf16.vlgmr.msra.gmra.mxu1 %v883_v26 }
  0x85   : > { %487 = vmatpush1.bf16.msra.mxu0 %v1070_v4  ;;  %532 = vmatpush1.bf16.msra.mxu1 %v1070_v4 }
  0x86   : > { %488 = vmatprep.subr.bf16.mxu0 %v1075_v5  ;;  %533 = vmatprep.subr.bf16.mxu1 %v1075_v5 }
  0x87   : > { %518 = vmatprep.mubr.bf16.mxu0 %v1017_v2  ;;  %563 = vmatprep.mubr.bf16.mxu1 %v1017_v2 }
  0x89   : > { %489 = vmatpush1.bf16.msra.mxu0 %v1080_v6  ;;  %534 = vmatpush1.bf16.msra.mxu1 %v1080_v6 }
  0x8a   : > { %490 = vmatprep.subr.bf16.mxu0 %v1085_v7  ;;  %535 = vmatprep.subr.bf16.mxu1 %v1085_v7 }
  0x8d   : > { %491 = vmatpush1.bf16.msra.mxu0 %v1090_v8  ;;  %536 = vmatpush1.bf16.msra.mxu1 %v1090_v8 }
  0x8e   : > { %492 = vmatprep.subr.bf16.mxu0 %v1095_v9  ;;  %537 = vmatprep.subr.bf16.mxu1 %v1095_v9 }
  0x91   : > { %493 = vmatpush1.bf16.msra.mxu0 %v1100_v10  ;;  %538 = vmatpush1.bf16.msra.mxu1 %v1100_v10 }
  0x92   : > { %494 = vmatprep.subr.bf16.mxu0 %v1105_v11  ;;  %539 = vmatprep.subr.bf16.mxu1 %v1105_v11 }
  0x95   : > { %495 = vmatpush1.bf16.msra.mxu0 %v1110_v12  ;;  %540 = vmatpush1.bf16.msra.mxu1 %v1110_v12 }
  0x96   : > { %496 = vmatprep.subr.bf16.mxu0 %v1115_v13  ;;  %541 = vmatprep.subr.bf16.mxu1 %v1115_v13 }
  0x99   : > { %497 = vmatpush1.bf16.msra.mxu0 %v1120_v14  ;;  %542 = vmatpush1.bf16.msra.mxu1 %v1120_v14 }
  0x9a   : > { %498 = vmatprep.subr.bf16.mxu0 %v1125_v15  ;;  %543 = vmatprep.subr.bf16.mxu1 %v1125_v15 }
  0x9d   : > { %499 = vmatpush1.bf16.msra.mxu0 %v1130_v16  ;;  %544 = vmatpush1.bf16.msra.mxu1 %v1130_v16 }
  0x9e   : > { %500 = vmatprep.subr.bf16.mxu0 %v1135_v17  ;;  %545 = vmatprep.subr.bf16.mxu1 %v1135_v17 }
  0xa1   : > { %501 = vmatpush1.bf16.msra.mxu0 %v1140_v18  ;;  %546 = vmatpush1.bf16.msra.mxu1 %v1140_v18 }
  0xa2   : > { %576 = vmatprep.subr.bf16.mxu0 %v1067_v3  ;;  %621 = vmatprep.subr.bf16.mxu1 %v1067_v3 }
  0xa4   : > { %519 = vmatmul.mubr.bf16.vlgmr.msra.gmra.mxu0 %v884_v27  ;;  %564 = vmatmul.mubr.bf16.vlgmr.msra.gmra.mxu1 %v885_v28 }
  0xa5   : > { %577 = vmatpush1.bf16.msra.mxu0 %v1070_v4  ;;  %622 = vmatpush1.bf16.msra.mxu1 %v1070_v4 }
  0xa6   : > { %578 = vmatprep.subr.bf16.mxu0 %v1075_v5  ;;  %623 = vmatprep.subr.bf16.mxu1 %v1075_v5 }
  0xa7   : > { %608 = vmatprep.mubr.bf16.mxu0 %v1017_v2  ;;  %653 = vmatprep.mubr.bf16.mxu1 %v1017_v2 }
  0xa9   : > { %579 = vmatpush1.bf16.msra.mxu0 %v1080_v6  ;;  %624 = vmatpush1.bf16.msra.mxu1 %v1080_v6 }
  0xaa   : > { %580 = vmatprep.subr.bf16.mxu0 %v1085_v7  ;;  %625 = vmatprep.subr.bf16.mxu1 %v1085_v7 }
  0xad   : > { %581 = vmatpush1.bf16.msra.mxu0 %v1090_v8  ;;  %626 = vmatpush1.bf16.msra.mxu1 %v1090_v8 }
  0xae   : > { %582 = vmatprep.subr.bf16.mxu0 %v1095_v9  ;;  %627 = vmatprep.subr.bf16.mxu1 %v1095_v9 }
  0xb1   : > { %583 = vmatpush1.bf16.msra.mxu0 %v1100_v10  ;;  %628 = vmatpush1.bf16.msra.mxu1 %v1100_v10 }
  0xb2   : > { %584 = vmatprep.subr.bf16.mxu0 %v1105_v11  ;;  %629 = vmatprep.subr.bf16.mxu1 %v1105_v11 }
  0xb5   : > { %585 = vmatpush1.bf16.msra.mxu0 %v1110_v12  ;;  %630 = vmatpush1.bf16.msra.mxu1 %v1110_v12 }
  0xb6   : > { %586 = vmatprep.subr.bf16.mxu0 %v1115_v13  ;;  %631 = vmatprep.subr.bf16.mxu1 %v1115_v13 }
  0xb9   : > { %587 = vmatpush1.bf16.msra.mxu0 %v1120_v14  ;;  %632 = vmatpush1.bf16.msra.mxu1 %v1120_v14 }
  0xba   : > { %588 = vmatprep.subr.bf16.mxu0 %v1125_v15  ;;  %633 = vmatprep.subr.bf16.mxu1 %v1125_v15 }
  0xbd   : > { %589 = vmatpush1.bf16.msra.mxu0 %v1130_v16  ;;  %634 = vmatpush1.bf16.msra.mxu1 %v1130_v16 }
  0xbe   : > { %590 = vmatprep.subr.bf16.mxu0 %v1135_v17  ;;  %635 = vmatprep.subr.bf16.mxu1 %v1135_v17 }
  0xc1   : > { %591 = vmatpush1.bf16.msra.mxu0 %v1140_v18  ;;  %636 = vmatpush1.bf16.msra.mxu1 %v1140_v18 }
  0xc4   : > { %609 = vmatmul.mubr.bf16.vlgmr.msra.gmra.mxu0 %v886_v29  ;;  %654 = vmatmul.mubr.bf16.vlgmr.msra.gmra.mxu1 %v887_v30 }
  0xe4   : > { %v160_v31 = vpop.f32.mrf.mxu0  ;;  %v205_v32 = vpop.f32.mrf.mxu1 }
  0xe5   : > { %v167_v33 = vmax.f32 %v1011_v1, %v160_v31 }
  0xe6   : > { %v162_v34 = vpop.f32.mrf.mxu0  ;;  %v207_v35 = vpop.f32.mrf.mxu1 }
  0xe7   : > { %v212_v36 = vmax.f32 %v167_v33, %v205_v32  ;;  %v168_v37 = vmax.f32 %v1007_v0, %v162_v34 }
  0xe8   : > { %v164_v38 = vpop.f32.mrf.mxu0  ;;  %v209_v39 = vpop.f32.mrf.mxu1 }
  0xe9   : > { %v213_v40 = vmax.f32 %v168_v37, %v207_v35  ;;  %v977_v39 = vld [vmem:[%s1417_s2 + $0x78] sm:$0xff] (%p20_p0)  }
  0xea   : > { %v165_v41 = vpop.f32.mrf.mxu0  ;;  %v210_v42 = vpop.f32.mrf.mxu1  ;;  %906 = vmatprep.subr.bf16.mxu0 (%p20_p0), %v977_v39 }
  0xeb   :  { %v978_v41 = vld [vmem:[%s1417_s2 + $0x38] sm:$0xff] (%p20_p0)   ;;  %v979_v42 = vld [vmem:[%s1417_s2 + $0x70] sm:$0xff] (%p20_p0)  }
  0xec   :  { %907 = vmatpush3.bf16.msra.mxu0 (%p20_p0), %v978_v41 }
  0xed   :  { %908 = vmatprep.subr.bf16.mxu0 (%p20_p0), %v979_v42 }
 0x104   : > { %v250_v43 = vpop.f32.mrf.mxu0  ;;  %v295_v44 = vpop.f32.mrf.mxu1 }
 0x105   : > { %v257_v45 = vmax.f32 %v212_v36, %v250_v43  ;;  %v980_v43 = vld [vmem:[%s1417_s2 + $0x30] sm:$0xff] (%p20_p0)  }
 0x106   : > { %v252_v46 = vpop.f32.mrf.mxu0  ;;  %v297_v47 = vpop.f32.mrf.mxu1  ;;  %909 = vmatpush3.bf16.msra.mxu0 (%p20_p0), %v980_v43 }
 0x107   : > { %v302_v48 = vmax.f32 %v257_v45, %v295_v44  ;;  %v258_v49 = vmax.f32 %v213_v40, %v252_v46  ;;  %v981_v44 = vld [vmem:[%s1417_s2 + $0x68] sm:$0xff] (%p20_p0)   ;;  %v983_v46 = vld [vmem:[%s1417_s2 + $0x60] sm:$0xff] (%p20_p0)  }
 0x108   : > { %v254_v50 = vpop.f32.mrf.mxu0  ;;  %v299_v51 = vpop.f32.mrf.mxu1  ;;  %v982_v45 = vld [vmem:[%s1417_s2 + $0x28] sm:$0xff] (%p20_p0)   ;;  %910 = vmatprep.subr.bf16.mxu0 (%p20_p0), %v981_v44 }
 0x109   : > { %v303_v52 = vmax.f32 %v258_v49, %v297_v47  ;;  %v984_v47 = vld [vmem:[%s1417_s2 + $0x20] sm:$0xff] (%p20_p0)   ;;  %v986_v49 = vld [vmem:[%s1417_s2 + $0x18] sm:$0xff] (%p20_p0)   ;;  %v987_v50 = vld [vmem:[%s1417_s2 + $0x50] sm:$0xff] (%p20_p0)  }
 0x10a   : > { %v255_v53 = vpop.f32.mrf.mxu0  ;;  %v300_v54 = vpop.f32.mrf.mxu1  ;;  %911 = vmatpush3.bf16.msra.mxu0 (%p20_p0), %v982_v45  ;;  %v988_v51 = vld [vmem:[%s1417_s2 + $0x10] sm:$0xff] (%p20_p0)  }
 0x10b   :  { %912 = vmatprep.subr.bf16.mxu0 (%p20_p0), %v983_v46  ;;  %v990_v53 = vld [vmem:[%s1417_s2 + $0x8] sm:$0xff] (%p20_p0)   ;;  %v991_v54 = vld [vmem:[%s1417_s2 + $0x40] sm:$0xff] (%p20_p0)  }
 0x10e   :  { %913 = vmatpush3.bf16.msra.mxu0 (%p20_p0), %v984_v47 }
 0x124   : > { %v340_v55 = vpop.f32.mrf.mxu0  ;;  %v385_v56 = vpop.f32.mrf.mxu1 }
 0x125   : > { %v347_v57 = vmax.f32 %v302_v48, %v340_v55  ;;  %v985_v48 = vld [vmem:[%s1417_s2 + $0x58] sm:$0xff] (%p20_p0)   ;;  %v992_v55 = vld [vmem:[%s1417_s2] sm:$0xff] (%p20_p0)  }
 0x126   : > { %v342_v58 = vpop.f32.mrf.mxu0  ;;  %v387_v59 = vpop.f32.mrf.mxu1  ;;  %914 = vmatprep.subr.bf16.mxu0 (%p20_p0), %v985_v48 }
 0x127   : > { %v392_v60 = vmax.f32 %v347_v57, %v385_v56  ;;  %v348_v61 = vmax.f32 %v303_v52, %v342_v58  ;;  %915 = vmatpush3.bf16.msra.mxu0 (%p20_p0), %v986_v49  ;;  %v989_v52 = vld [vmem:[%s1417_s2 + $0x48] sm:$0xff] (%p20_p0)   ;;  %v888_v58 = vld [vmem:[%s1418_s3] ss:$0 sm:$0xff] (%p20_p0) }
 0x128   : > { %v344_v62 = vpop.f32.mrf.mxu0  ;;  %v389_v63 = vpop.f32.mrf.mxu1  ;;  %916 = vmatprep.subr.bf16.mxu0 (%p20_p0), %v987_v50 }
 0x129   : > { %v393_v0 = vmax.f32 %v348_v61, %v387_v59 }
 0x12a   : > { %v345_v1 = vpop.f32.mrf.mxu0  ;;  %v390_v2 = vpop.f32.mrf.mxu1 }
 0x12b   :  { %917 = vmatpush3.bf16.msra.mxu0 (%p20_p0), %v988_v51 }
 0x12c   :  { %918 = vmatprep.subr.bf16.mxu0 (%p20_p0), %v989_v52 }
 0x12f   :  { %919 = vmatpush3.bf16.msra.mxu0 (%p20_p0), %v990_v53 }
 0x130   :  { %920 = vmatprep.subr.bf16.mxu0 (%p20_p0), %v991_v54 }
 0x133   :  { %921 = vmatpush3.bf16.msra.mxu0 (%p20_p0), %v992_v55 }
 0x144   : > { %v430_v3 = vpop.f32.mrf.mxu0  ;;  %v475_v4 = vpop.f32.mrf.mxu1 }
 0x145   : > { %v437_v19 = vmax.f32 %v392_v60, %v430_v3 }
 0x146   : > { %v432_v5 = vpop.f32.mrf.mxu0  ;;  %v477_v6 = vpop.f32.mrf.mxu1 }
 0x147   : > { %v438_v20 = vmax.f32 %v393_v0, %v432_v5  ;;  %v482_v21 = vmax.f32 %v437_v19, %v475_v4 }
 0x148   : > { %v434_v7 = vpop.f32.mrf.mxu0  ;;  %v479_v8 = vpop.f32.mrf.mxu1 }
 0x149   : > { %v483_v22 = vmax.f32 %v438_v20, %v477_v6 }
 0x14a   : > { %v435_v9 = vpop.f32.mrf.mxu0  ;;  %v480_v10 = vpop.f32.mrf.mxu1 }
 0x164   : > { %v520_v11 = vpop.f32.mrf.mxu0  ;;  %v565_v12 = vpop.f32.mrf.mxu1 }
 0x165   : > { %v527_v23 = vmax.f32 %v482_v21, %v520_v11 }
 0x166   : > { %v522_v13 = vpop.f32.mrf.mxu0  ;;  %v567_v14 = vpop.f32.mrf.mxu1 }
 0x167   : > { %v528_v24 = vmax.f32 %v483_v22, %v522_v13  ;;  %v572_v25 = vmax.f32 %v527_v23, %v565_v12 }
 0x168   : > { %v524_v15 = vpop.f32.mrf.mxu0  ;;  %v569_v16 = vpop.f32.mrf.mxu1 }
 0x169   : > { %v573_v28 = vmax.f32 %v528_v24, %v567_v14 }
 0x16a   : > { %v525_v17 = vpop.f32.mrf.mxu0  ;;  %v570_v18 = vpop.f32.mrf.mxu1 }
 0x184   : > { %v610_v26 = vpop.f32.mrf.mxu0  ;;  %v655_v27 = vpop.f32.mrf.mxu1 }
 0x185   : > { %v617_v29 = vmax.f32 %v572_v25, %v610_v26 }
 0x186   : > { %v612_v30 = vpop.f32.mrf.mxu0  ;;  %v657_v31 = vpop.f32.mrf.mxu1 }
 0x187   : > { %v662_v32 = vmax.f32 %v617_v29, %v655_v27   ;;  %v618_v33 = vmax.f32 %v573_v28, %v612_v30  ;;  %22 = sbr.rel (!%p20_p0) target bundleno = 1 (0x1), region = 55 }
 0x188   : > { %v614_v34 = vpop.f32.mrf.mxu0  ;;  %v659_v35 = vpop.f32.mrf.mxu1 }
 0x189   : > { %v663_v36 = vmax.f32 %v618_v33, %v657_v31   ;;  %v1421_v1 = vmov %v662_v32  ;;  %v664_v56 = vpack.c.bf16 (%p20_p0), %v662_v32, %v662_v32 }
 0x18a   : > { %v615_v37 = vpop.f32.mrf.mxu0  ;;  %v660_v38 = vpop.f32.mrf.mxu1 }
 0x18b   : > { %v1420_v0 = vmov %v663_v36  ;;  %v665_v40 = vpack.c.bf16 (%p20_p0), %v663_v36, %v663_v36 }
 0x18d   :  { %833 = vmatprep.mubr.bf16.mxu0 %v665_v40 }
 0x18e   :  { %834 = vmatmul.mubr.bf16.vlgmr.msra.gmra.mxu0 %v664_v56 }
 0x24e   :  { %v922_v57 = vpop.f32.mrf.mxu0 }
 0x250   :  { %v923_v59 = vpop.f32.mrf.mxu0 }
 0x251   :  { %v924_v60 = vadd.f32 %v923_v59, %v922_v57 }
 0x252   :  { %v925_v61 = vpop.f32.mrf.mxu0 }
 0x253   :  { %v836_v62 = vadd.f32 %v924_v60, %v888_v58 }
 0x254   :  { %v926_v63 = vpop.f32.mrf.mxu0 }
 0x255   :  { %841 = vst [vmem:[%s1419_s4] sm:$0xff] %v836_v62 }

</bundles_post_ra>
